<compile_context>
chip_gen: v6e
topology: v6e:2x2x1
jax: 0.10.0
libtpu: 0.0.40
codegen_flags: <defaults>
</compile_context>

<pallas_src>
import functools

import jax
import jax.numpy as jnp
from jax.experimental import pallas as pl
from jax.experimental.pallas import tpu as pltpu


def _normalize_kernel(x_ref, mean_ref, inv_ref, o_ref):
    # x_ref/o_ref: (block_rows, block_cols) tile of the flattened image batch.
    # mean_ref/inv_ref: (block_rows, 1) f32 per-row (i.e. per (b, c)) stats.
    x = x_ref[...].astype(jnp.float32)
    m = mean_ref[...]       # broadcast over lanes
    inv = inv_ref[...]      # precomputed 1/sd -> VPU multiply, not divide
    o_ref[...] = ((x - m) * inv).astype(o_ref.dtype)


def _sublane_align(dtype):
    """Native sublane multiple: packed dtypes occupy multiple rows per sublane."""
    itemsize = jnp.dtype(dtype).itemsize
    return {4: 8, 2: 16, 1: 32}.get(itemsize, 8)


def _pick_blocks(rows, cols, dtype, target_block_bytes):
    """Choose an aligned (block_rows, block_cols) under the VMEM budget."""
    elem = jnp.dtype(dtype).itemsize
    row_align = _sublane_align(dtype)
    lane_align = 128

    # Lane (column) block: full extent if it fits the budget, otherwise the
    # largest multiple of 128 that does (tail handled by cdiv grid + masking).
    max_cols_budget = max(lane_align, target_block_bytes // elem)
    if cols <= max_cols_budget:
        block_cols = cols
    else:
        block_cols = (max_cols_budget // lane_align) * lane_align

    # Sublane (row) block under the remaining budget.
    row_bytes = max(block_cols * elem, 1)
    max_rows_budget = max(row_align, target_block_bytes // row_bytes)
    if rows <= max_rows_budget:
        block_rows = rows
    else:
        block_rows = (max_rows_budget // row_align) * row_align

    # Megacore floor (v7x has 2 TensorCores): make sure at least one
    # "parallel" axis has >= 2 blocks so both cores get work.
    if pl.cdiv(rows, block_rows) * pl.cdiv(cols, block_cols) < 2:
        if block_cols >= 2 * lane_align:
            block_cols = ((block_cols // 2 + lane_align - 1) // lane_align) * lane_align
        elif block_rows >= 2 * row_align:
            block_rows = ((block_rows // 2 + row_align - 1) // row_align) * row_align
        # else: the tensor is a single native tile; nothing to split.

    return block_rows, block_cols


def normalize_layer(x, means_f32, inv_sds_f32, *, target_block_bytes=4 << 20,
                    donate_input=False):
    """(x - means[c]) * inv_sds[c] broadcast per channel. x: (B, C, H, W) NCHW."""
    B, C, H, W = x.shape
    rows, cols = B * C, H * W
    elem = jnp.dtype(x.dtype).itemsize

    # Lane-dense flattened view: row r = b*C + c, columns = spatial pixels.
    x2 = x.reshape(rows, cols)

    # Per-row statistics columns (f32). Tiny producers; fused into the call
    # operands (allow_input_fusion) / constant-folded under jit.
    mean_col = jnp.tile(means_f32, B).reshape(rows, 1)
    inv_col = jnp.tile(inv_sds_f32, B).reshape(rows, 1)

    block_rows, block_cols = _pick_blocks(rows, cols, x.dtype, target_block_bytes)
    grid = (pl.cdiv(rows, block_rows), pl.cdiv(cols, block_cols))

    # read x + stats, write out
    bytes_accessed = 2 * rows * cols * elem + 2 * rows * 4

    out2 = pl.pallas_call(
        _normalize_kernel,
        out_shape=jax.ShapeDtypeStruct((rows, cols), x.dtype),
        grid=grid,
        in_specs=[
            pl.BlockSpec((block_rows, block_cols), lambda i, j: (i, j)),  # x
            pl.BlockSpec((block_rows, 1), lambda i, j: (i, 0)),           # mean col
            pl.BlockSpec((block_rows, 1), lambda i, j: (i, 0)),           # 1/sd col
        ],
        out_specs=pl.BlockSpec((block_rows, block_cols), lambda i, j: (i, j)),
        compiler_params=pltpu.CompilerParams(
            dimension_semantics=("parallel", "parallel"),
            # 4x 4 MiB (double-buffered in+out) + stats fits with headroom on
            # v5e/v6e (128 MiB) and under v7x's 64 MiB physical VMEM.
            vmem_limit_bytes=32 << 20,
            # Let XLA fuse the tiny stats broadcasts into the call operands.
            allow_input_fusion=[False, True, True],
        ),
        cost_estimate=pl.CostEstimate(
            flops=2 * rows * cols, transcendentals=0, bytes_accessed=bytes_accessed
        ),
        input_output_aliases=({0: 0} if donate_input else {}),
    )(x2, mean_col, inv_col)

    return out2.reshape(B, C, H, W)


class NormalizeLayer:
    """Mirrors the PyTorch module: per-channel standardization as layer 0."""

    def __init__(self, means, sds):
        # Hoisted dataset constants: f32 cast + reciprocal done once.
        self.means = jnp.asarray(means, dtype=jnp.float32)
        self.inv_sds = 1.0 / jnp.asarray(sds, dtype=jnp.float32)
        self._fwd = jax.jit(functools.partial(normalize_layer))

    def __call__(self, x):
        return self._fwd(x, self.means, self.inv_sds)


if __name__ == "__main__":
    B, C, H, W = 2, 4, 16, 16
    key = jax.random.PRNGKey(0)
    x = jax.random.normal(key, (B, C, H, W), dtype=jnp.float32)

    # Deterministic "dataset statistics" (module __init__ takes per-channel lists).
    means = [0.485, 0.456, 0.406, 0.500][:C]
    sds = [0.229, 0.224, 0.225, 0.250][:C]

    layer = NormalizeLayer(means, sds)
    out = jax.block_until_ready(layer(x))

    # Reference check (plain JAX, mirrors the PyTorch broadcast semantics).
    m = jnp.asarray(means, jnp.float32)[None, :, None, None]
    s = jnp.asarray(sds, jnp.float32)[None, :, None, None]
    ref = (x - m) / s
    assert out.shape == (B, C, H, W)
    assert out.dtype == x.dtype
    assert jnp.allclose(out, ref, atol=1e-5, rtol=1e-5)

    print("KERNEL_OK")
</pallas_src>

<mosaic_0001>
module attributes {stable_mosaic.version = 11 : i64} {
  func.func @_normalize_kernel(%arg0: i32, %arg1: i32, %arg2: memref<8x128xf32, #tpu.memory_space<vmem>>, %arg3: memref<8x1xf32, #tpu.memory_space<vmem>>, %arg4: memref<8x1xf32, #tpu.memory_space<vmem>>, %arg5: memref<8x128xf32, #tpu.memory_space<vmem>>) attributes {dimension_semantics = [#tpu.dimension_semantics<parallel>, #tpu.dimension_semantics<parallel>], iteration_bounds = array<i64: 1, 2>, scalar_prefetch = 0 : i64, scratch_operands = 0 : i64, tpu.core_type = #tpu.core_type<tc>, window_params = [{transform_indices = @transform_0, window_bounds = array<i64: 8, 128>}, {transform_indices = @transform_1, window_bounds = array<i64: 8, 1>}, {transform_indices = @transform_2, window_bounds = array<i64: 8, 1>}, {transform_indices = @transform_3, window_bounds = array<i64: 8, 128>}]} {
    %c0 = arith.constant 0 : index
    %c0_0 = arith.constant 0 : index
    %0 = vector.load %arg2[%c0, %c0_0] : memref<8x128xf32, #tpu.memory_space<vmem>>, vector<8x128xf32>
    %c0_1 = arith.constant 0 : index
    %c0_2 = arith.constant 0 : index
    %1 = vector.load %arg3[%c0_1, %c0_2] : memref<8x1xf32, #tpu.memory_space<vmem>>, vector<8x1xf32>
    %c0_3 = arith.constant 0 : index
    %c0_4 = arith.constant 0 : index
    %2 = vector.load %arg4[%c0_3, %c0_4] : memref<8x1xf32, #tpu.memory_space<vmem>>, vector<8x1xf32>
    %3 = vector.broadcast %1 : vector<8x1xf32> to vector<8x128xf32>
    %4 = arith.subf %0, %3 : vector<8x128xf32>
    %5 = vector.broadcast %2 : vector<8x1xf32> to vector<8x128xf32>
    %6 = arith.mulf %4, %5 : vector<8x128xf32>
    %c0_5 = arith.constant 0 : index
    %c0_6 = arith.constant 0 : index
    %7 = vector.load %arg5[%c0_5, %c0_6] : memref<8x128xf32, #tpu.memory_space<vmem>>, vector<8x128xf32>
    tpu.vector_store %arg5[%c0_5, %c0_6], %6 {strides = array<i32>} : memref<8x128xf32, #tpu.memory_space<vmem>>, vector<8x128xf32>,
    return
  }
  func.func @transform_0(%arg0: i32, %arg1: i32) -> (i32, i32) {
    %c0_i32 = arith.constant 0 : i32
    return %arg0, %arg1 : i32, i32
  }
  func.func @transform_1(%arg0: i32, %arg1: i32) -> (i32, i32) {
    %c0_i32 = arith.constant 0 : i32
    %c0_i32_0 = arith.constant 0 : i32
    return %arg0, %c0_i32 : i32, i32
  }
  func.func @transform_2(%arg0: i32, %arg1: i32) -> (i32, i32) {
    %c0_i32 = arith.constant 0 : i32
    %c0_i32_0 = arith.constant 0 : i32
    return %arg0, %c0_i32 : i32, i32
  }
  func.func @transform_3(%arg0: i32, %arg1: i32) -> (i32, i32) {
    %c0_i32 = arith.constant 0 : i32
    return %arg0, %arg1 : i32, i32
  }
}

</mosaic_0001>

<bundles_post_ra>
// kernel: tile.1
= control target key start
LH: loop header
LB: loop body
LE: loop exit
PB: predicated region body
PF: predicated region fallthrough
CT: control target
= control target key end

     0   :  { %s35_s8 = smov 125   ;;  %vm8_vm0 = vcmask 7168   ;;  %s36_s11 = smov 126   ;;  %s62_s0 = inlined_call_operand.vmem [shape: f32[2,4], index: 0, kind: input, shape index: {}]   ;;  %s63_s1 = inlined_call_operand.vmem [shape: f32[8,1], index: 1, kind: output, shape index: {}]  }
   0x1   :  { %v5_v0 = vld [vmem:[%s62_s0] sm:$0x3]  ;;  %s34_s0 = smov 127  }
   0x2   :  { %6 = vst [vmem:[#allocation0] sm:$0x3] %v5_v0 }
   0x9   :  { %v10_v1 = vld [vmem:[#allocation0] sm:$0x3]  }
   0xa   :  { %v22_v2 = vld [vmem:[#allocation0] sm:$0x3]   ;;  %11 = vrot.lane.b32.xlu0 %v10_v1, %s34_s0 }
   0xb   :  { %23 = vrot.lane.b32.xlu1 %v22_v2, %s35_s8  ;;  %v7_v3 = vld [vmem:[#allocation0] sm:$0x3]  }
   0xc   :  { %v16_v4 = vld [vmem:[#allocation0] sm:$0x3]   ;;  %9 = vst.msk [vmem:[%s63_s1] ss:$4 sm:$0x3] %vm8_vm0, %v7_v3  }
   0xe   :  { %17 = vrot.lane.b32.xlu0 %v16_v4, %s36_s11 }
  0x7c   :  { %v12_v5 = vpop.permute.xlu0 %11  }
  0x7d   :  { %v24_v6 = vpop.permute.xlu1 %23   ;;  %28 = vst.msk [vmem:[%s63_s1 + $0x1] ss:$4 sm:$0x3] %vm8_vm0, %v12_v5  }
  0x7e   :  { %30 = vst.msk [vmem:[%s63_s1 + $0x3] ss:$4 sm:$0x3] %vm8_vm0, %v24_v6  }
  0x80   :  { %v18_v7 = vpop.permute.xlu0 %17  }
  0x81   :  { %29 = vst.msk [vmem:[%s63_s1 + $0x2] ss:$4 sm:$0x3] %vm8_vm0, %v18_v7  }

// kernel: tile.13
= control target key start
LH: loop header
LB: loop body
LE: loop exit
PB: predicated region body
PF: predicated region fallthrough
CT: control target
= control target key end

     0   :  { %s22_s0 = inlined_call_operand.vmem [shape: f32[4], index: 0, kind: input, shape index: {}]   ;;  %s23_s1 = inlined_call_operand.vmem [shape: f32[2,4], index: 1, kind: output, shape index: {}]  }
   0x1   :  { %v4_v0 = vld [vmem:[%s22_s0] ss:$0 sm:$0xff] }
   0x2   :  { %5 = vst [vmem:[%s23_s1] sm:$0x3] %v4_v0 }

// kernel: normalize_layer.1
= control target key start
LH: loop header
LB: loop body
LE: loop exit
PB: predicated region body
PF: predicated region fallthrough
CT: control target
= control target key end

     0   :  { %s448_s12 = smov 0   ;;  %s450_s13 = smov 0   ;;  %s480_s0 = inlined_call_operand.vmem [shape: f32[8,256], index: 0, kind: input, shape index: {}]   ;;  %s481_s1 = inlined_call_operand.vmem [shape: f32[8,1], index: 1, kind: input, shape index: {}]   ;;  %s482_s2 = inlined_call_operand.vmem [shape: f32[8,1], index: 2, kind: input, shape index: {}]   ;;  %s483_s3 = inlined_call_operand.vmem [shape: f32[8,256], index: 3, kind: output, shape index: {}]  }
   0x1   :  { %s452_s14 = smov 0  }
   0x2 LB: > { %s22_s15 = sadd.s32 1, %s421_s13  ;;  %p372_p0 = scmp.ge.s32.totalorder %s425_s14, 1  ;;  %s425_s14 = sphi %s452_s14, %s13_s14   ;;  %s421_s13 = sphi %s450_s13, %s485_s13   ;;  %s417_s12 = sphi %s448_s12, %s484_s12  }
   0x3   : > { %p23_p1 = scmp.ge.s32.totalorder %s22_s15, 2  ;;  %p174_p2 = scmp.lt.s32.totalorder %s425_s14, 3 }
   0x5   : > { %s487_s15 = smov (%p23_p1, %s22_s15), 0  ;;  %p175_p3 = pnand %p372_p0, %p174_p2 }
   0x6   : > { %p214_p4 = scmp.lt.s32.totalorder (!%p175_p3), %s417_s12, 1 }
   0x7   : > { %178 = sbr.rel (%p175_p3) target bundleno = 145 (0x91), region = 32 }
   0xc   : > { %v237_v0 = vld [vmem:[%s481_s1] sm:$0xff]  ;;  %v427_v1 = vmov 0   ;;  %s489_s12 = smov (!%p214_p4, %s417_s12), 1 }
   0xd   : > { %402 = vset.pattern.permute.xlu0 %v427_v1  ;;  %v238_v2 = vld [vmem:[%s482_s2] sm:$0xff]  ;;  %s373_s20 = sshll.u32 %s489_s12, 3 }
   0xe   : > { %241 = vperm.xlu0 %402, %v237_v0   ;;  %s219_s23 = scalar_lea.vmem %s480_s0, %s373_s20  ;;  %s235_s26 = scalar_lea.vmem %s483_s3, %s373_s20 }
   0xf   : > { %v236_v4 = vld [vmem:[%s219_s23] sm:$0xff] }
  0x12   : > { %247 = vperm.xlu0 %402, %v238_v2  }
  0x89   : > { %v242_v3 = vpop.permute.xlu0 %241 }
  0x8a   : > { %v244_v5 = vsub.f32 %v236_v4, %v242_v3 }
  0x8d   : > { %v248_v6 = vpop.permute.xlu0 %247 }
  0x8e   : > { %v250_v7 = vmul.f32 %v248_v6, %v244_v5 }
  0x90   : > { %251 = vst [vmem:[%s235_s26] sm:$0xff] %v250_v7 }
  0x91 PF: > { %s13_s14 = sadd.s32 1, %s425_s14   ;;  %s484_s12 = smov %s421_s13 }
  0x92   : > { %p10_p5 = scmp.ge.s32.totalorder %s13_s14, 4   ;;  %s485_s13 = smov %s487_s15 }
  0x94   :  { %12 = sbr.rel (!%p10_p5) target bundleno = 2 (0x2), region = 68 }

</bundles_post_ra>
